<compile_context>
chip_gen: v7x
topology: tpu7x:2x2x1
jax: 0.10.0
libtpu: 0.0.40
codegen_flags: <defaults>
</compile_context>

<pallas_src>
import jax
import jax.numpy as jnp
from jax.experimental import pallas as pl
from jax.experimental.pallas import tpu as pltpu

SELU_ALPHA = 1.6732632423543772848170429916717
SELU_SCALE = 1.0507009873554804934193349852946


def make_nmf_kernel(num_layers):
    """Builds the kernel for a fixed number of MLP layers (static unroll)."""

    def kernel(*refs):
        # refs layout:
        #   [0] u_gmf (TB, D1)      [1] v_gmf (TB, D1)     [2] mlp_in (TB, mlp_layers[0])
        #   [3 .. 3+2L)  (w_k (in_k, out_k), b_k (1, out_k)) per layer
        #   [3+2L] w_eff_t (D2, D1)      [4+2L] bias_eff (1,1) in SMEM
        #   [5+2L] out (TB, 1)
        ug_ref, vg_ref, m_ref = refs[0], refs[1], refs[2]
        layer_refs = refs[3:3 + 2 * num_layers]
        weff_t_ref = refs[3 + 2 * num_layers]
        bias_ref = refs[4 + 2 * num_layers]
        out_ref = refs[5 + 2 * num_layers]

        # GMF vector: elementwise product (VPU).
        g = ug_ref[...] * vg_ref[...]                          # (TB, D1) f32

        # MLP tower: Linear + SELU per layer (MXU matmul, f32 accumulation).
        x = m_ref[...]                                         # (TB, mlp_layers[0])
        for k in range(num_layers):
            w = layer_refs[2 * k][...]                         # (in_k, out_k)
            b = layer_refs[2 * k + 1][...]                     # (1, out_k)
            x = jnp.dot(x, w, preferred_element_type=jnp.float32) + b
            x = SELU_SCALE * jnp.where(x > 0.0, x, SELU_ALPHA * (jnp.exp(x) - 1.0))

        # Folded Bilinear + Linear(→1) head:
        #   logits[b] = bias_eff + sum_i g[b,i] * (sum_j m[b,j] * W_eff[i,j])
        # One (TB, D2) x (D2, D1) MXU matmul, a VPU multiply, a lane (XLU) reduce.
        t = jnp.dot(x, weff_t_ref[...], preferred_element_type=jnp.float32)  # (TB, D1)
        logits = jnp.sum(g * t, axis=-1, keepdims=True) + bias_ref[0, 0]
        out_ref[...] = logits.astype(out_ref.dtype)

    return kernel


def prepare_kernel_params(params):
    """One-time fold/transposes into kernel layout (kept out of the per-call path)."""
    w_bi = params["w_bi"]        # (O, D1, D2), O = D1 - 1   (torch Bilinear layout)
    b_bi = params["b_bi"]        # (O,)
    w_lin = params["w_lin"]      # (1, O)                    (torch Linear layout)
    b_lin = params["b_lin"]      # (1,)

    # Fold the final Linear head into the bilinear weight.
    w_eff_t = jnp.einsum("o,oij->ji", w_lin[0], w_bi)                 # (D2, D1) == W_eff^T
    bias_eff = (b_lin[0] + w_lin[0] @ b_bi).reshape(1, 1)             # (1, 1) scalar

    # MLP weights to (in, out) layout, biases to (1, out).
    fc = [(w.T, b.reshape(1, -1)) for (w, b) in params["fc_layers"]]

    return {
        "gmf_emb_user": params["gmf_emb_user"],
        "gmf_emb_item": params["gmf_emb_item"],
        "mlp_emb_user": params["mlp_emb_user"],
        "mlp_emb_item": params["mlp_emb_item"],
        "fc": fc,
        "w_eff_t": w_eff_t,
        "bias_eff": bias_eff,
    }


def nmf_forward(user_idx, item_idx, kparams, *, block_b=512):
    """Embedding gather + concat in plain JAX; MLP + folded bilinear head in Pallas."""
    ug = kparams["gmf_emb_user"][user_idx]                     # (B, D1)
    vg = kparams["gmf_emb_item"][item_idx]                     # (B, D1)
    um = kparams["mlp_emb_user"][user_idx]                     # (B, Dm)
    vm = kparams["mlp_emb_item"][item_idx]                     # (B, Dm)
    m_in = jnp.concatenate([um, vm], axis=1)                   # (B, 2*Dm)

    B, D1 = ug.shape
    Dm0 = m_in.shape[1]
    fc = kparams["fc"]
    w_eff_t = kparams["w_eff_t"]                               # (D2, D1)
    bias_eff = kparams["bias_eff"]                             # (1, 1)

    # Batch tiling: single block for small B, 512-row blocks otherwise.
    TB = B if B <= block_b else block_b
    B_pad = pl.cdiv(B, TB) * TB
    if B_pad != B:
        pad = ((0, B_pad - B), (0, 0))
        ug = jnp.pad(ug, pad)
        vg = jnp.pad(vg, pad)
        m_in = jnp.pad(m_in, pad)

    def batch_spec(ncols):
        return pl.BlockSpec((TB, ncols), lambda i: (i, 0))

    def const_spec(shape):
        # Weights stay VMEM-resident across grid steps (constant block index).
        return pl.BlockSpec(shape, lambda i, n=len(shape): (0,) * n)

    in_specs = [batch_spec(D1), batch_spec(D1), batch_spec(Dm0)]
    args = [ug, vg, m_in]
    for (w, b) in fc:
        in_specs += [const_spec(w.shape), const_spec(b.shape)]
        args += [w, b]
    in_specs += [
        const_spec(w_eff_t.shape),
        pl.BlockSpec((1, 1), lambda i: (0, 0),
                     memory_space=pltpu.MemorySpace.SMEM),     # scalar bias in SMEM
    ]
    args += [w_eff_t, bias_eff]

    out = pl.pallas_call(
        make_nmf_kernel(len(fc)),
        out_shape=jax.ShapeDtypeStruct((B_pad, 1), jnp.float32),
        grid=(B_pad // TB,),
        in_specs=in_specs,
        out_specs=pl.BlockSpec((TB, 1), lambda i: (i, 0)),
        compiler_params=pltpu.CompilerParams(
            dimension_semantics=("parallel",)),
    )(*args)
    return out[:B]


def reference_forward(user_idx, item_idx, params):
    """Pure-JAX reference matching the PyTorch NMF.forward semantics (dropout=identity)."""
    g = params["gmf_emb_user"][user_idx] * params["gmf_emb_item"][item_idx]
    m = jnp.concatenate([params["mlp_emb_user"][user_idx],
                         params["mlp_emb_item"][item_idx]], axis=1)
    for (w, b) in params["fc_layers"]:
        m = m @ w.T + b
        m = SELU_SCALE * jnp.where(m > 0.0, m, SELU_ALPHA * (jnp.exp(m) - 1.0))
    h = jnp.einsum("bi,oij,bj->bo", g, params["w_bi"], m) + params["b_bi"]
    return h @ params["w_lin"].T + params["b_lin"]


if __name__ == "__main__":
    # Small, self-consistent config (mlp_layers[0] must equal 2 * latent_dim_mlp).
    num_users, num_items = 64, 100
    latent_dim, latent_dim_mlp = 32, 16
    mlp_layers = [32, 32, 16, 8]          # 3 fc layers: 32->32, 32->16, 16->8
    batch = 8
    D1, D2, O = latent_dim, mlp_layers[-1], latent_dim - 1

    key = jax.random.PRNGKey(0)
    keys = iter(jax.random.split(key, 20))

    def unif(k, shape, fan_in):
        bound = 1.0 / jnp.sqrt(jnp.float32(fan_in))
        return jax.random.uniform(k, shape, minval=-bound, maxval=bound, dtype=jnp.float32)

    fc_layers = []
    for in_size, out_size in zip(mlp_layers[:-1], mlp_layers[1:]):
        w = unif(next(keys), (out_size, in_size), in_size)     # torch Linear (out, in)
        b = unif(next(keys), (out_size,), in_size)
        fc_layers.append((w, b))

    params = {
        "gmf_emb_user": jax.random.normal(next(keys), (num_users, latent_dim), jnp.float32),
        "gmf_emb_item": jax.random.normal(next(keys), (num_items, latent_dim), jnp.float32),
        "mlp_emb_user": jax.random.normal(next(keys), (num_users, latent_dim_mlp), jnp.float32),
        "mlp_emb_item": jax.random.normal(next(keys), (num_items, latent_dim_mlp), jnp.float32),
        "fc_layers": fc_layers,
        # torch.nn.Bilinear(D1, D2, O): weight (O, D1, D2), bias (O,)
        "w_bi": unif(next(keys), (O, D1, D2), D1),
        "b_bi": unif(next(keys), (O,), D1),
        # torch.nn.Linear(O, 1): weight (1, O), bias (1,)
        "w_lin": unif(next(keys), (1, O), O),
        "b_lin": unif(next(keys), (1,), O),
    }

    user_idx = jax.random.randint(next(keys), (batch,), 0, num_users, dtype=jnp.int32)
    item_idx = jax.random.randint(next(keys), (batch,), 0, num_items, dtype=jnp.int32)

    kparams = prepare_kernel_params(params)
    logits = jax.block_until_ready(nmf_forward(user_idx, item_idx, kparams))
    ref = jax.block_until_ready(reference_forward(user_idx, item_idx, params))

    assert logits.shape == (batch, 1), logits.shape
    assert jnp.allclose(logits, ref, atol=1e-3, rtol=1e-3), (logits, ref)
    print("KERNEL_OK")
</pallas_src>

<mosaic_0001>
module attributes {stable_mosaic.version = 11 : i64} {
  func.func @kernel(%arg0: i32, %arg1: memref<8x32xf32, #tpu.memory_space<vmem>>, %arg2: memref<8x32xf32, #tpu.memory_space<vmem>>, %arg3: memref<8x32xf32, #tpu.memory_space<vmem>>, %arg4: memref<32x32xf32, #tpu.memory_space<vmem>>, %arg5: memref<1x32xf32, #tpu.memory_space<vmem>>, %arg6: memref<32x16xf32, #tpu.memory_space<vmem>>, %arg7: memref<1x16xf32, #tpu.memory_space<vmem>>, %arg8: memref<16x8xf32, #tpu.memory_space<vmem>>, %arg9: memref<1x8xf32, #tpu.memory_space<vmem>>, %arg10: memref<8x32xf32, #tpu.memory_space<vmem>>, %arg11: memref<1x1xf32, #tpu.memory_space<smem>>, %arg12: memref<8x1xf32, #tpu.memory_space<vmem>>) attributes {dimension_semantics = [#tpu.dimension_semantics<parallel>], iteration_bounds = array<i64: 1>, scalar_prefetch = 0 : i64, scratch_operands = 0 : i64, tpu.core_type = #tpu.core_type<tc>, window_params = [{transform_indices = @transform_0, window_bounds = array<i64: 8, 32>}, {transform_indices = @transform_1, window_bounds = array<i64: 8, 32>}, {transform_indices = @transform_2, window_bounds = array<i64: 8, 32>}, {pipeline_mode = #tpu.pipeline_mode<synchronous>, transform_indices = @transform_3, window_bounds = array<i64: 32, 32>}, {pipeline_mode = #tpu.pipeline_mode<synchronous>, transform_indices = @transform_4, window_bounds = array<i64: 1, 32>}, {pipeline_mode = #tpu.pipeline_mode<synchronous>, transform_indices = @transform_5, window_bounds = array<i64: 32, 16>}, {pipeline_mode = #tpu.pipeline_mode<synchronous>, transform_indices = @transform_6, window_bounds = array<i64: 1, 16>}, {pipeline_mode = #tpu.pipeline_mode<synchronous>, transform_indices = @transform_7, window_bounds = array<i64: 16, 8>}, {pipeline_mode = #tpu.pipeline_mode<synchronous>, transform_indices = @transform_8, window_bounds = array<i64: 1, 8>}, {pipeline_mode = #tpu.pipeline_mode<synchronous>, transform_indices = @transform_9, window_bounds = array<i64: 8, 32>}, {transform_indices = @transform_10, window_bounds = array<i64: 1, 1>}, {transform_indices = @transform_11, window_bounds = array<i64: 8, 1>}]} {
    %c0 = arith.constant 0 : index
    %c0_0 = arith.constant 0 : index
    %0 = vector.load %arg1[%c0, %c0_0] : memref<8x32xf32, #tpu.memory_space<vmem>>, vector<8x32xf32>
    %c0_1 = arith.constant 0 : index
    %c0_2 = arith.constant 0 : index
    %1 = vector.load %arg2[%c0_1, %c0_2] : memref<8x32xf32, #tpu.memory_space<vmem>>, vector<8x32xf32>
    %2 = arith.mulf %0, %1 : vector<8x32xf32>
    %c0_3 = arith.constant 0 : index
    %c0_4 = arith.constant 0 : index
    %3 = vector.load %arg3[%c0_3, %c0_4] : memref<8x32xf32, #tpu.memory_space<vmem>>, vector<8x32xf32>
    %c0_5 = arith.constant 0 : index
    %c0_6 = arith.constant 0 : index
    %4 = vector.load %arg4[%c0_5, %c0_6] : memref<32x32xf32, #tpu.memory_space<vmem>>, vector<32x32xf32>
    %c0_7 = arith.constant 0 : index
    %c0_8 = arith.constant 0 : index
    %5 = vector.load %arg5[%c0_7, %c0_8] : memref<1x32xf32, #tpu.memory_space<vmem>>, vector<1x32xf32>
    %cst = arith.constant dense<0.000000e+00> : vector<8x32xf32>
    %6 = tpu.matmul %3, %4, %cst {dimension_numbers = #tpu.dot_dimension_numbers<[1], [0], [0], [1], [0, 0, 1, 1], [], []>} : vector<8x32xf32>, vector<32x32xf32>, vector<8x32xf32> -> vector<8x32xf32>
    %7 = vector.broadcast %5 : vector<1x32xf32> to vector<8x32xf32>
    %8 = arith.addf %6, %7 : vector<8x32xf32>
    %cst_9 = arith.constant 0.000000e+00 : f32
    %9 = vector.broadcast %cst_9 : f32 to vector<8x32xf32>
    %10 = arith.cmpf ogt, %8, %9 : vector<8x32xf32>
    %11 = math.exp %8 : vector<8x32xf32>
    %cst_10 = arith.constant 1.000000e+00 : f32
    %12 = vector.broadcast %cst_10 : f32 to vector<8x32xf32>
    %13 = arith.subf %11, %12 : vector<8x32xf32>
    %cst_11 = arith.constant 1.67326319 : f32
    %14 = vector.broadcast %cst_11 : f32 to vector<8x32xf32>
    %15 = arith.mulf %14, %13 : vector<8x32xf32>
    %16 = arith.select %10, %8, %15 : vector<8x32xi1>, vector<8x32xf32>
    %cst_12 = arith.constant 1.05070102 : f32
    %17 = vector.broadcast %cst_12 : f32 to vector<8x32xf32>
    %18 = arith.mulf %17, %16 : vector<8x32xf32>
    %c0_13 = arith.constant 0 : index
    %c0_14 = arith.constant 0 : index
    %19 = vector.load %arg6[%c0_13, %c0_14] : memref<32x16xf32, #tpu.memory_space<vmem>>, vector<32x16xf32>
    %c0_15 = arith.constant 0 : index
    %c0_16 = arith.constant 0 : index
    %20 = vector.load %arg7[%c0_15, %c0_16] : memref<1x16xf32, #tpu.memory_space<vmem>>, vector<1x16xf32>
    %cst_17 = arith.constant dense<0.000000e+00> : vector<8x16xf32>
    %21 = tpu.matmul %18, %19, %cst_17 {dimension_numbers = #tpu.dot_dimension_numbers<[1], [0], [0], [1], [0, 0, 1, 1], [], []>} : vector<8x32xf32>, vector<32x16xf32>, vector<8x16xf32> -> vector<8x16xf32>
    %22 = vector.broadcast %20 : vector<1x16xf32> to vector<8x16xf32>
    %23 = arith.addf %21, %22 : vector<8x16xf32>
    %cst_18 = arith.constant 0.000000e+00 : f32
    %24 = vector.broadcast %cst_18 : f32 to vector<8x16xf32>
    %25 = arith.cmpf ogt, %23, %24 : vector<8x16xf32>
    %26 = math.exp %23 : vector<8x16xf32>
    %cst_19 = arith.constant 1.000000e+00 : f32
    %27 = vector.broadcast %cst_19 : f32 to vector<8x16xf32>
    %28 = arith.subf %26, %27 : vector<8x16xf32>
    %cst_20 = arith.constant 1.67326319 : f32
    %29 = vector.broadcast %cst_20 : f32 to vector<8x16xf32>
    %30 = arith.mulf %29, %28 : vector<8x16xf32>
    %31 = arith.select %25, %23, %30 : vector<8x16xi1>, vector<8x16xf32>
    %cst_21 = arith.constant 1.05070102 : f32
    %32 = vector.broadcast %cst_21 : f32 to vector<8x16xf32>
    %33 = arith.mulf %32, %31 : vector<8x16xf32>
    %c0_22 = arith.constant 0 : index
    %c0_23 = arith.constant 0 : index
    %34 = vector.load %arg8[%c0_22, %c0_23] : memref<16x8xf32, #tpu.memory_space<vmem>>, vector<16x8xf32>
    %c0_24 = arith.constant 0 : index
    %c0_25 = arith.constant 0 : index
    %35 = vector.load %arg9[%c0_24, %c0_25] : memref<1x8xf32, #tpu.memory_space<vmem>>, vector<1x8xf32>
    %cst_26 = arith.constant dense<0.000000e+00> : vector<8x8xf32>
    %36 = tpu.matmul %33, %34, %cst_26 {dimension_numbers = #tpu.dot_dimension_numbers<[1], [0], [0], [1], [0, 0, 1, 1], [], []>} : vector<8x16xf32>, vector<16x8xf32>, vector<8x8xf32> -> vector<8x8xf32>
    %37 = vector.broadcast %35 : vector<1x8xf32> to vector<8x8xf32>
    %38 = arith.addf %36, %37 : vector<8x8xf32>
    %cst_27 = arith.constant 0.000000e+00 : f32
    %39 = vector.broadcast %cst_27 : f32 to vector<8x8xf32>
    %40 = arith.cmpf ogt, %38, %39 : vector<8x8xf32>
    %41 = math.exp %38 : vector<8x8xf32>
    %cst_28 = arith.constant 1.000000e+00 : f32
    %42 = vector.broadcast %cst_28 : f32 to vector<8x8xf32>
    %43 = arith.subf %41, %42 : vector<8x8xf32>
    %cst_29 = arith.constant 1.67326319 : f32
    %44 = vector.broadcast %cst_29 : f32 to vector<8x8xf32>
    %45 = arith.mulf %44, %43 : vector<8x8xf32>
    %46 = arith.select %40, %38, %45 : vector<8x8xi1>, vector<8x8xf32>
    %cst_30 = arith.constant 1.05070102 : f32
    %47 = vector.broadcast %cst_30 : f32 to vector<8x8xf32>
    %48 = arith.mulf %47, %46 : vector<8x8xf32>
    %c0_31 = arith.constant 0 : index
    %c0_32 = arith.constant 0 : index
    %49 = vector.load %arg10[%c0_31, %c0_32] : memref<8x32xf32, #tpu.memory_space<vmem>>, vector<8x32xf32>
    %cst_33 = arith.constant dense<0.000000e+00> : vector<8x32xf32>
    %50 = tpu.matmul %48, %49, %cst_33 {dimension_numbers = #tpu.dot_dimension_numbers<[1], [0], [0], [1], [0, 0, 1, 1], [], []>} : vector<8x8xf32>, vector<8x32xf32>, vector<8x32xf32> -> vector<8x32xf32>
    %51 = arith.mulf %2, %50 : vector<8x32xf32>
    %cst_34 = arith.constant dense<0.000000e+00> : vector<8xf32>
    %52 = vector.multi_reduction <add>, %51, %cst_34 [1] : vector<8x32xf32> to vector<8xf32>
    %53 = vector.shape_cast %52 : vector<8xf32> to vector<8x1xf32>
    %c0_35 = arith.constant 0 : index
    %c0_36 = arith.constant 0 : index
    %54 = memref.load %arg11[%c0_35, %c0_36] : memref<1x1xf32, #tpu.memory_space<smem>>
    %55 = vector.broadcast %54 : f32 to vector<8x1xf32>
    %56 = arith.addf %53, %55 : vector<8x1xf32>
    %c0_37 = arith.constant 0 : index
    %c0_38 = arith.constant 0 : index
    %57 = vector.load %arg12[%c0_37, %c0_38] : memref<8x1xf32, #tpu.memory_space<vmem>>, vector<8x1xf32>
    tpu.vector_store %arg12[%c0_37, %c0_38], %56 {strides = array<i32>} : memref<8x1xf32, #tpu.memory_space<vmem>>, vector<8x1xf32>,
    return
  }
  func.func @transform_0(%arg0: i32) -> (i32, i32) {
    %c0_i32 = arith.constant 0 : i32
    %c0_i32_0 = arith.constant 0 : i32
    return %arg0, %c0_i32 : i32, i32
  }
  func.func @transform_1(%arg0: i32) -> (i32, i32) {
    %c0_i32 = arith.constant 0 : i32
    %c0_i32_0 = arith.constant 0 : i32
    return %arg0, %c0_i32 : i32, i32
  }
  func.func @transform_2(%arg0: i32) -> (i32, i32) {
    %c0_i32 = arith.constant 0 : i32
    %c0_i32_0 = arith.constant 0 : i32
    return %arg0, %c0_i32 : i32, i32
  }
  func.func @transform_3(%arg0: i32) -> (i32, i32) {
    %c0_i32 = arith.constant 0 : i32
    %c0_i32_0 = arith.constant 0 : i32
    %c0_i32_1 = arith.constant 0 : i32
    return %c0_i32, %c0_i32_0 : i32, i32
  }
  func.func @transform_4(%arg0: i32) -> (i32, i32) {
    %c0_i32 = arith.constant 0 : i32
    %c0_i32_0 = arith.constant 0 : i32
    %c0_i32_1 = arith.constant 0 : i32
    return %c0_i32, %c0_i32_0 : i32, i32
  }
  func.func @transform_5(%arg0: i32) -> (i32, i32) {
    %c0_i32 = arith.constant 0 : i32
    %c0_i32_0 = arith.constant 0 : i32
    %c0_i32_1 = arith.constant 0 : i32
    return %c0_i32, %c0_i32_0 : i32, i32
  }
  func.func @transform_6(%arg0: i32) -> (i32, i32) {
    %c0_i32 = arith.constant 0 : i32
    %c0_i32_0 = arith.constant 0 : i32
    %c0_i32_1 = arith.constant 0 : i32
    return %c0_i32, %c0_i32_0 : i32, i32
  }
  func.func @transform_7(%arg0: i32) -> (i32, i32) {
    %c0_i32 = arith.constant 0 : i32
    %c0_i32_0 = arith.constant 0 : i32
    %c0_i32_1 = arith.constant 0 : i32
    return %c0_i32, %c0_i32_0 : i32, i32
  }
  func.func @transform_8(%arg0: i32) -> (i32, i32) {
    %c0_i32 = arith.constant 0 : i32
    %c0_i32_0 = arith.constant 0 : i32
    %c0_i32_1 = arith.constant 0 : i32
    return %c0_i32, %c0_i32_0 : i32, i32
  }
  func.func @transform_9(%arg0: i32) -> (i32, i32) {
    %c0_i32 = arith.constant 0 : i32
    %c0_i32_0 = arith.constant 0 : i32
    %c0_i32_1 = arith.constant 0 : i32
    return %c0_i32, %c0_i32_0 : i32, i32
  }
  func.func @transform_10(%arg0: i32) -> (i32, i32) {
    %c0_i32 = arith.constant 0 : i32
    %c0_i32_0 = arith.constant 0 : i32
    %c0_i32_1 = arith.constant 0 : i32
    return %c0_i32, %c0_i32_0 : i32, i32
  }
  func.func @transform_11(%arg0: i32) -> (i32, i32) {
    %c0_i32 = arith.constant 0 : i32
    %c0_i32_0 = arith.constant 0 : i32
    return %arg0, %c0_i32 : i32, i32
  }
}

</mosaic_0001>

<bundles_post_ra>
// kernel: tpu_custom_call.1
= control target key start
LH: loop header
LB: loop body
LE: loop exit
PB: predicated region body
PF: predicated region fallthrough
CT: control target
= control target key end

     0   :  { %v487_v0 = vmov 0.0|0.0   ;;  %vm488_vm0 = vmmov 0   ;;  %v489_v4 = vmov 0.0   ;;  %vm54_vm1 = vcmask 261120   ;;  %s614_s3 = inlined_call_operand.vmem [shape: f32[32,32], index: 3, kind: input, shape index: {}]   ;;  %s615_s2 = inlined_call_operand.vmem [shape: f32[8,32], index: 2, kind: input, shape index: {}]   ;;  %s616_s5 = inlined_call_operand.vmem [shape: f32[32,16], index: 5, kind: input, shape index: {}]   ;;  %s617_s4 = inlined_call_operand.vmem [shape: f32[1,32], index: 4, kind: input, shape index: {}]   ;;  %s618_s7 = inlined_call_operand.vmem [shape: f32[16,8], index: 7, kind: input, shape index: {}]   ;;  %s619_s6 = inlined_call_operand.vmem [shape: f32[1,16], index: 6, kind: input, shape index: {}]   ;;  %s620_s9 = inlined_call_operand.vmem [shape: f32[8,32], index: 9, kind: input, shape index: {}]   ;;  %s621_s8 = inlined_call_operand.vmem [shape: f32[1,8], index: 8, kind: input, shape index: {}]   ;;  %s622_s0 = inlined_call_operand.vmem [shape: f32[8,32], index: 0, kind: input, shape index: {}]   ;;  %s623_s1 = inlined_call_operand.vmem [shape: f32[8,32], index: 1, kind: input, shape index: {}]   ;;  %s624_s10 = inlined_call_operand.<no memory space> [shape: f32[1,1], index: 10, kind: input, shape index: {}]   ;;  %s625_s11 = inlined_call_operand.vmem [shape: f32[8,1], index: 11, kind: output, shape index: {}]  }
   0x1   :  { %463 = vmatprep.subr.bf16.mxu0 %v487_v0  ;;  %v43_v1 = vld [vmem:[%s614_s3] sm:$0xff]  ;;  %v44_v2 = vld [vmem:[%s614_s3 + $0x8] sm:$0xff]  ;;  %v45_v3 = vld [vmem:[%s614_s3 + $0x10] sm:$0xff]  ;;  %437 = vmatprep.mubr.msk.f32.mxu0 %vm488_vm0, %v489_v4  ;;  %vm235_vm4 = vcmask 130048   ;;  %vm317_vm6 = vcmask 64512   ;;  %v396_v56 = vstv %s624_s10  ;;  %vm398_vm7 = vcmask 7168  }
   0x2   :  { %v464_v5 = vpack.c.bf16 %v44_v2, %v43_v1  ;;  %v46_v6 = vld [vmem:[%s614_s3 + $0x18] sm:$0xff]  ;;  %469 = vmatprep.subr.bf16.mxu1 %v487_v0  ;;  %448 = vmatprep.mubr.msk.f32.mxu1 %vm488_vm0, %v489_v4  ;;  %v42_v8 = vld [vmem:[%s615_s2] sm:$0xff]  ;;  %v136_v10 = vld [vmem:[%s616_s5 + $0x8] sm:$0xff] }
   0x3   :  { %v467_v7 = vpack.c.bf16 %v46_v6, %v45_v3  ;;  %v135_v9 = vld [vmem:[%s616_s5] sm:$0xff]  ;;  %v137_v12 = vld [vmem:[%s616_s5 + $0x10] sm:$0xff]  ;;  %v138_v13 = vld [vmem:[%s616_s5 + $0x18] sm:$0xff] }
   0x4   :  { %465 = vmatpush3.bf16.msra.mxu0 %v464_v5  ;;  %v470_v11 = vpack.c.bf16 %v136_v10, %v135_v9  ;;  %v473_v14 = vpack.c.bf16 %v138_v13, %v137_v12  ;;  %v404_v15 = vld [vmem:[%s617_s4] ss:$0 sm:$0xff]  ;;  %v227_v26 = vld [vmem:[%s618_s7 + $0x8] sm:$0xff] }
   0x5   :  { %466 = vmatprep.subr.bf16.mxu0 %v487_v0  ;;  %v226_v25 = vld [vmem:[%s618_s7] sm:$0xff] }
   0x6   :  { %471 = vmatpush3.bf16.msra.mxu1 %v470_v11  ;;  %v476_v27 = vpack.c.bf16 %v227_v26, %v226_v25  ;;  %v407_v28 = vld [vmem:[%s619_s6] ss:$0 sm:$0xff] }
   0x7   :  { %472 = vmatprep.subr.bf16.mxu1 %v487_v0  ;;  %v316_v38 = vld [vmem:[%s620_s9] sm:$0xff] }
   0x8   :  { %468 = vmatpush3.bf16.msra.mxu0 %v467_v7  ;;  %v410_v39 = vld [vmem:[%s621_s8] ss:$0 sm:$0xff] }
   0x9   :  { %475 = vmatprep.subr.bf16.mxu0 %v487_v0  ;;  %v39_v49 = vld [vmem:[%s622_s0] sm:$0xff] }
   0xa   :  { %474 = vmatpush3.bf16.msra.mxu1 %v473_v14  ;;  %v40_v50 = vld [vmem:[%s623_s1] sm:$0xff] }
   0xb   :  { %438 = vmatmul.mubr.msk.f32.vlgmr.msra.gmra.mrb[0].mxu0 %vm54_vm1, %v42_v8  ;;  %458 = vmatprep.subr.mxu1 %v489_v4  ;;  %v41_v51 = vmul.f32 %v40_v50, %v39_v49 }
   0xc   :  { %455 = vmatprep.mubr.msk.f32.mxu0 %vm488_vm0, %v489_v4  ;;  %477 = vmatpush3.bf16.msra.mxu0 %v476_v27 }
  0xde   :  { %v124_v16 = vpop.f32.mrb[0].mxu0 }
  0xdf   :  { %v125_v17 = vadd.f32 %v404_v15, %v124_v16  ;;  %v439_v18 = vpop.f32.mrb[1].mxu0 }
  0xe1   :  { %v129_v19 = vmul.f32 1.442695, %v125_v17  ;;  %vm128_vm2 = vcmp.gt.f32.partialorder %v125_v17, 0.0 }
  0xe3   :  { %481 = vpow2.f32 %v129_v19 }
  0xed   :  { %v482_v20 = vpop.eup %481 }
  0xee   :  { %v406_v21 = vadd.f32 -1.0, %v482_v20 }
  0xf0   :  { %v132_v22 = vmul.f32 1.6732632, %v406_v21 }
  0xf2   :  { %v133_v23 = vsel %vm128_vm2, %v125_v17, %v132_v22 }
  0xf3   :  { %v134_v24 = vmul.f32 1.050701, %v133_v23 }
  0xf5   :  { %449 = vmatmul.mubr.msk.f32.vlgmr.msra.gmra.mrb[0].mxu1 %vm54_vm1, %v134_v24 }
  0xf6   :  { %460 = vmatprep.mubr.msk.f32.mxu1 %vm488_vm0, %v489_v4  ;;  %459 = vmatpush3.msra.mxu1 %v316_v38 }
 0x1c8   :  { %v215_v29 = vpop.f32.mrb[0].mxu1 }
 0x1c9   :  { %v216_v30 = vadd.f32 %v407_v28, %v215_v29  ;;  %v450_v31 = vpop.f32.mrb[1].mxu1 }
 0x1cb   :  { %v220_v32 = vmul.f32 1.442695, %v216_v30  ;;  %vm219_vm3 = vcmp.gt.f32.partialorder %v216_v30, 0.0 }
 0x1cd   :  { %483 = vpow2.f32 %v220_v32 }
 0x1d7   :  { %v484_v33 = vpop.eup %483 }
 0x1d8   :  { %v409_v34 = vadd.f32 -1.0, %v484_v33 }
 0x1da   :  { %v223_v35 = vmul.f32 1.6732632, %v409_v34 }
 0x1dc   :  { %v224_v36 = vsel %vm219_vm3, %v216_v30, %v223_v35 }
 0x1dd   :  { %v225_v37 = vmul.f32 1.050701, %v224_v36 }
 0x1df   :  { %456 = vmatmul.mubr.msk.f32.vlgmr.msra.gmra.mrb[2].mxu0 %vm235_vm4, %v225_v37 }
 0x2b2   :  { %v305_v40 = vpop.f32.mrb[2].mxu0 }
 0x2b3   :  { %v306_v41 = vadd.f32 %v410_v39, %v305_v40  ;;  %v457_v42 = vpop.f32.mrb[3].mxu0 }
 0x2b5   :  { %v310_v43 = vmul.f32 1.442695, %v306_v41  ;;  %vm309_vm5 = vcmp.gt.f32.partialorder %v306_v41, 0.0 }
 0x2b7   :  { %485 = vpow2.f32 %v310_v43 }
 0x2c1   :  { %v486_v44 = vpop.eup %485 }
 0x2c2   :  { %v412_v45 = vadd.f32 -1.0, %v486_v44 }
 0x2c4   :  { %v313_v46 = vmul.f32 1.6732632, %v412_v45 }
 0x2c6   :  { %v314_v47 = vsel %vm309_vm5, %v306_v41, %v313_v46 }
 0x2c7   :  { %v315_v48 = vmul.f32 1.050701, %v314_v47 }
 0x2c9   :  { %461 = vmatmul.mubr.msk.f32.vlgmr.msra.gmra.mrb[2].mxu1 %vm317_vm6, %v315_v48 }
 0x39c   :  { %v387_v52 = vpop.f32.mrb[2].mxu1 }
 0x39d   :  { %v391_v53 = vmul.f32 %v387_v52, %v41_v51  ;;  %v462_v54 = vpop.f32.mrb[3].mxu1 }
 0x39f   :  { %v392_v55 = vsel %vm54_vm1, %v391_v53, 0.0 }
 0x3a0   :  { %393 = vadd.xlane.f32.xlu0 %v392_v55 }
 0x42d   :  { %v394_v57 = vpop.xlane.xlu0 %393 }
 0x42e   :  { %v397_v58 = vadd.f32 %v396_v56, %v394_v57 }
 0x430   :  { %399 = vst.msk [vmem:[%s625_s11] sm:$0xff] %vm398_vm7, %v397_v58 }

</bundles_post_ra>
